<compile_context>
chip_gen: v6e
topology: v6e:2x2x1
jax: 0.10.0
libtpu: 0.0.40
codegen_flags: <defaults>
</compile_context>

<pallas_src>
import functools

import jax
import jax.numpy as jnp
from jax.experimental import pallas as pl
from jax.experimental.pallas import tpu as pltpu


def _ca_kernel(x_ref, w1_ref, b1_ref, w2_ref, b2_ref, o_ref, *, inv_hw):
    """Fused global-avg-pool + 2-layer MLP gate + scale for a batch block.

    x_ref  : (B_blk, F*C, H*W)  activations, f-major / c-minor rows, lane-dense H*W
    w1_ref : (F*C, Hid)         first Linear weight, transposed + column-permuted
    b1_ref : (1, Hid)
    w2_ref : (Hid, F*C)         second Linear weight, transposed + row-permuted
    b2_ref : (1, F*C)
    o_ref  : (B_blk, F*C, H*W)
    """
    # global average pool over the spatial (lane) axis -> (B_blk, FC), f32
    pooled = (jnp.sum(x_ref[...].astype(jnp.float32), axis=2) * inv_hw)

    # squeeze-excite MLP: Linear -> ReLU -> Linear -> Sigmoid (f32 accum)
    h = jnp.dot(pooled, w1_ref[...],
                preferred_element_type=jnp.float32) + b1_ref[...]   # (B, Hid)
    h = jnp.maximum(h, 0.0)
    a = jnp.dot(h, w2_ref[...],
                preferred_element_type=jnp.float32) + b2_ref[...]   # (B, FC)
    a = jax.nn.sigmoid(a)

    # broadcast the per-(f,c) gate over all spatial positions; re-read x from
    # VMEM for the store phase instead of keeping the whole tile live.
    o_ref[...] = (x_ref[...] * a[:, :, None]).astype(o_ref.dtype)


def ca_layer3d_forward(x, w1, b1, w2, b2, *, block_bytes_target=2 << 20):
    """x: (N, n_feats, channels, H, W); w1/b1/w2/b2 in torch Linear layout
    (out_features, in_features) with the C*F input/output ordering c-major."""
    N, F, C, H, W = x.shape
    FC = F * C
    HW = H * W
    Hid = w1.shape[0]

    # --- glue: permute FC weights from the module's c-major (c*F + f) ordering
    #     to the kernel's f-major (f*C + c) ordering, and transpose so the
    #     kernel can right-multiply lane-dense (B, FC) pooled activations.
    j = jnp.arange(FC)
    perm = (j % C) * F + (j // C)                        # f-major idx -> c-major idx
    w1k = jnp.transpose(w1[:, perm]).astype(jnp.float32)  # (FC, Hid)
    b1k = b1.reshape(1, Hid).astype(jnp.float32)           # (1, Hid)
    w2k = jnp.transpose(w2[perm, :]).astype(jnp.float32)  # (Hid, FC)
    b2k = b2[perm].reshape(1, FC).astype(jnp.float32)      # (1, FC)

    # lane-dense layout: spatial on the last (lane) axis; keep native dtype.
    x_flat = x.reshape(N, FC, HW)

    # --- pick batch block size: ~block_bytes_target per input block, but keep
    #     at least ~4 grid steps (>=2) so megacore sharding and the 2-deep
    #     DMA pipeline have work.  B_blk must divide N (no ragged last block).
    per_batch_bytes = FC * HW * x.dtype.itemsize
    b_cap = max(1, block_bytes_target // per_batch_bytes)
    if N >= 2:
        b_cap = min(b_cap, max(1, N // 4))
    b_cap = int(max(1, b_cap))
    B_blk = max(d for d in range(1, b_cap + 1) if N % d == 0)
    grid = (N // B_blk,)

    kernel = functools.partial(_ca_kernel, inv_hw=1.0 / HW)

    out = pl.pallas_call(
        kernel,
        out_shape=jax.ShapeDtypeStruct((N, FC, HW), x.dtype),
        grid_spec=pltpu.PrefetchScalarGridSpec(
            num_scalar_prefetch=0,
            grid=grid,
            in_specs=[
                pl.BlockSpec((B_blk, FC, HW), lambda n: (n, 0, 0)),
                pl.BlockSpec((FC, Hid), lambda n: (0, 0)),
                pl.BlockSpec((1, Hid), lambda n: (0, 0)),
                pl.BlockSpec((Hid, FC), lambda n: (0, 0)),
                pl.BlockSpec((1, FC), lambda n: (0, 0)),
            ],
            out_specs=pl.BlockSpec((B_blk, FC, HW), lambda n: (n, 0, 0)),
        ),
        compiler_params=pltpu.CompilerParams(
            dimension_semantics=("parallel",)),
    )(x_flat, w1k, b1k, w2k, b2k)

    return out.reshape(N, F, C, H, W)


def ref_forward(x, w1, b1, w2, b2):
    """Pure-JAX reference matching the PyTorch forward exactly."""
    N, F, C, H, W = x.shape
    out = jnp.transpose(x, (0, 2, 1, 3, 4))              # (N, C, F, H, W)
    pooled = jnp.mean(out.astype(jnp.float32), axis=(3, 4)).reshape(N, C * F)
    h = jnp.maximum(pooled @ w1.T + b1, 0.0)
    a = jax.nn.sigmoid(h @ w2.T + b2)
    attn = a.reshape(N, C, F)[:, :, :, None, None]
    out = (out * attn).astype(x.dtype)
    return jnp.transpose(out, (0, 2, 1, 3, 4))           # (N, F, C, H, W)


if __name__ == "__main__":
    # channels=4, n_feats=8, reduction=4, spatial 16x16, batch 2
    N, C, F, H, W = 2, 4, 8, 16, 16
    reduction = 4
    Hid = (F * C) // reduction

    key = jax.random.PRNGKey(0)
    k = jax.random.split(key, 5)
    x = jax.random.normal(k[0], (N, F, C, H, W), jnp.float32)
    w1 = jax.random.normal(k[1], (Hid, F * C), jnp.float32) * 0.1
    b1 = jax.random.normal(k[2], (Hid,), jnp.float32) * 0.1
    w2 = jax.random.normal(k[3], (F * C, Hid), jnp.float32) * 0.1
    b2 = jax.random.normal(k[4], (F * C,), jnp.float32) * 0.1

    out = ca_layer3d_forward(x, w1, b1, w2, b2)
    out = jax.block_until_ready(out)

    ref = ref_forward(x, w1, b1, w2, b2)
    assert out.shape == (N, F, C, H, W)
    assert out.dtype == x.dtype
    err = float(jnp.max(jnp.abs(out.astype(jnp.float32) - ref.astype(jnp.float32))))
    assert jnp.allclose(out.astype(jnp.float32), ref.astype(jnp.float32),
                        atol=1e-4, rtol=1e-4), err

    print("KERNEL_OK")
</pallas_src>

<mosaic_0001>
module attributes {stable_mosaic.version = 11 : i64} {
  func.func @_ca_kernel(%arg0: i32, %arg1: memref<1x32x256xf32, #tpu.memory_space<vmem>>, %arg2: memref<32x8xf32, #tpu.memory_space<vmem>>, %arg3: memref<1x8xf32, #tpu.memory_space<vmem>>, %arg4: memref<8x32xf32, #tpu.memory_space<vmem>>, %arg5: memref<1x32xf32, #tpu.memory_space<vmem>>, %arg6: memref<1x32x256xf32, #tpu.memory_space<vmem>>) attributes {dimension_semantics = [#tpu.dimension_semantics<parallel>], iteration_bounds = array<i64: 2>, scalar_prefetch = 0 : i64, scratch_operands = 0 : i64, tpu.core_type = #tpu.core_type<tc>, window_params = [{transform_indices = @transform_0, window_bounds = array<i64: 1, 32, 256>}, {pipeline_mode = #tpu.pipeline_mode<synchronous>, transform_indices = @transform_1, window_bounds = array<i64: 32, 8>}, {pipeline_mode = #tpu.pipeline_mode<synchronous>, transform_indices = @transform_2, window_bounds = array<i64: 1, 8>}, {pipeline_mode = #tpu.pipeline_mode<synchronous>, transform_indices = @transform_3, window_bounds = array<i64: 8, 32>}, {pipeline_mode = #tpu.pipeline_mode<synchronous>, transform_indices = @transform_4, window_bounds = array<i64: 1, 32>}, {transform_indices = @transform_5, window_bounds = array<i64: 1, 32, 256>}]} {
    %c0 = arith.constant 0 : index
    %c0_0 = arith.constant 0 : index
    %c0_1 = arith.constant 0 : index
    %0 = vector.load %arg1[%c0, %c0_0, %c0_1] : memref<1x32x256xf32, #tpu.memory_space<vmem>>, vector<1x32x256xf32>
    %cst = arith.constant dense<0.000000e+00> : vector<1x32xf32>
    %1 = vector.multi_reduction <add>, %0, %cst [2] : vector<1x32x256xf32> to vector<1x32xf32>
    %cst_2 = arith.constant 3.906250e-03 : f32
    %2 = vector.broadcast %cst_2 : f32 to vector<1x32xf32>
    %3 = arith.mulf %1, %2 : vector<1x32xf32>
    %c0_3 = arith.constant 0 : index
    %c0_4 = arith.constant 0 : index
    %4 = vector.load %arg2[%c0_3, %c0_4] : memref<32x8xf32, #tpu.memory_space<vmem>>, vector<32x8xf32>
    %cst_5 = arith.constant dense<0.000000e+00> : vector<1x8xf32>
    %5 = tpu.matmul %3, %4, %cst_5 {dimension_numbers = #tpu.dot_dimension_numbers<[1], [0], [0], [1], [0, 0, 1, 1], [], []>} : vector<1x32xf32>, vector<32x8xf32>, vector<1x8xf32> -> vector<1x8xf32>
    %c0_6 = arith.constant 0 : index
    %c0_7 = arith.constant 0 : index
    %6 = vector.load %arg3[%c0_6, %c0_7] : memref<1x8xf32, #tpu.memory_space<vmem>>, vector<1x8xf32>
    %7 = arith.addf %5, %6 : vector<1x8xf32>
    %cst_8 = arith.constant 0.000000e+00 : f32
    %8 = vector.broadcast %cst_8 : f32 to vector<1x8xf32>
    %9 = arith.maximumf %7, %8 : vector<1x8xf32>
    %c0_9 = arith.constant 0 : index
    %c0_10 = arith.constant 0 : index
    %10 = vector.load %arg4[%c0_9, %c0_10] : memref<8x32xf32, #tpu.memory_space<vmem>>, vector<8x32xf32>
    %cst_11 = arith.constant dense<0.000000e+00> : vector<1x32xf32>
    %11 = tpu.matmul %9, %10, %cst_11 {dimension_numbers = #tpu.dot_dimension_numbers<[1], [0], [0], [1], [0, 0, 1, 1], [], []>} : vector<1x8xf32>, vector<8x32xf32>, vector<1x32xf32> -> vector<1x32xf32>
    %c0_12 = arith.constant 0 : index
    %c0_13 = arith.constant 0 : index
    %12 = vector.load %arg5[%c0_12, %c0_13] : memref<1x32xf32, #tpu.memory_space<vmem>>, vector<1x32xf32>
    %13 = arith.addf %11, %12 : vector<1x32xf32>
    %14 = arith.negf %13 : vector<1x32xf32>
    %15 = math.exp %14 : vector<1x32xf32>
    %cst_14 = arith.constant 1.000000e+00 : f32
    %16 = vector.broadcast %cst_14 : f32 to vector<1x32xf32>
    %17 = arith.addf %16, %15 : vector<1x32xf32>
    %18 = arith.divf %16, %17 : vector<1x32xf32>
    %c0_15 = arith.constant 0 : index
    %c0_16 = arith.constant 0 : index
    %c0_17 = arith.constant 0 : index
    %19 = vector.load %arg1[%c0_15, %c0_16, %c0_17] : memref<1x32x256xf32, #tpu.memory_space<vmem>>, vector<1x32x256xf32>
    %20 = vector.shape_cast %18 : vector<1x32xf32> to vector<1x32x1xf32>
    %21 = vector.broadcast %20 : vector<1x32x1xf32> to vector<1x32x256xf32>
    %22 = arith.mulf %19, %21 : vector<1x32x256xf32>
    %c0_18 = arith.constant 0 : index
    %c0_19 = arith.constant 0 : index
    %c0_20 = arith.constant 0 : index
    %23 = vector.load %arg6[%c0_18, %c0_19, %c0_20] : memref<1x32x256xf32, #tpu.memory_space<vmem>>, vector<1x32x256xf32>
    tpu.vector_store %arg6[%c0_18, %c0_19, %c0_20], %22 {strides = array<i32>} : memref<1x32x256xf32, #tpu.memory_space<vmem>>, vector<1x32x256xf32>,
    return
  }
  func.func @transform_0(%arg0: i32) -> (i32, i32, i32) {
    %c0_i32 = arith.constant 0 : i32
    %c0_i32_0 = arith.constant 0 : i32
    %c0_i32_1 = arith.constant 0 : i32
    return %arg0, %c0_i32, %c0_i32_0 : i32, i32, i32
  }
  func.func @transform_1(%arg0: i32) -> (i32, i32) {
    %c0_i32 = arith.constant 0 : i32
    %c0_i32_0 = arith.constant 0 : i32
    %c0_i32_1 = arith.constant 0 : i32
    return %c0_i32, %c0_i32_0 : i32, i32
  }
  func.func @transform_2(%arg0: i32) -> (i32, i32) {
    %c0_i32 = arith.constant 0 : i32
    %c0_i32_0 = arith.constant 0 : i32
    %c0_i32_1 = arith.constant 0 : i32
    return %c0_i32, %c0_i32_0 : i32, i32
  }
  func.func @transform_3(%arg0: i32) -> (i32, i32) {
    %c0_i32 = arith.constant 0 : i32
    %c0_i32_0 = arith.constant 0 : i32
    %c0_i32_1 = arith.constant 0 : i32
    return %c0_i32, %c0_i32_0 : i32, i32
  }
  func.func @transform_4(%arg0: i32) -> (i32, i32) {
    %c0_i32 = arith.constant 0 : i32
    %c0_i32_0 = arith.constant 0 : i32
    %c0_i32_1 = arith.constant 0 : i32
    return %c0_i32, %c0_i32_0 : i32, i32
  }
  func.func @transform_5(%arg0: i32) -> (i32, i32, i32) {
    %c0_i32 = arith.constant 0 : i32
    %c0_i32_0 = arith.constant 0 : i32
    %c0_i32_1 = arith.constant 0 : i32
    return %arg0, %c0_i32, %c0_i32_0 : i32, i32, i32
  }
}

</mosaic_0001>

<bundles_post_ra>
// kernel: tpu_custom_call.1
= control target key start
LH: loop header
LB: loop body
LE: loop exit
PB: predicated region body
PF: predicated region fallthrough
CT: control target
= control target key end

     0   :  { %10 = vsyncpa [#allocation3], 0  ;;  %s1022_s0 = inlined_call_operand.hbm [shape: f32[2,32,256], index: 0, kind: input, shape index: {}]   ;;  %s1023_s1 = inlined_call_operand.vmem [shape: f32[32,8], index: 1, kind: input, shape index: {}]   ;;  %s1024_s2 = inlined_call_operand.vmem [shape: f32[1,8], index: 2, kind: input, shape index: {}]   ;;  %s1025_s3 = inlined_call_operand.vmem [shape: f32[8,32], index: 3, kind: input, shape index: {}]   ;;  %s1026_s4 = inlined_call_operand.vmem [shape: f32[1,32], index: 4, kind: input, shape index: {}]   ;;  %s1027_s5 = inlined_call_operand.hbm [shape: f32[2,32,256], index: 5, kind: output, shape index: {}]  }
   0x1   :  { %12 = vsyncpa [#allocation3 + $0x1], 0 }
   0x2   :  { %13 = vsyncpa [#allocation4], 0 }
   0x3   :  { %15 = vsyncpa [#allocation4 + $0x1], 0  ;;  %s811_s18 = smov 0   ;;  %s813_s19 = smov 0  }
   0x4   :  { %s815_s20 = smov 0   ;;  %s817_s21 = smov 0  }
   0x5 LB: > { %s832_s22 = sadd.s32 4294967295, %s771_s21   ;;  %s581_s23 = sadd.s32 4294967294, %s771_s21   ;;  %s771_s21 = sphi %s817_s21, %s1042_s21   ;;  %s767_s20 = sphi %s815_s20, %s1041_s20   ;;  %s763_s19 = sphi %s813_s19, %s1040_s19   ;;  %s759_s18 = sphi %s811_s18, %s1039_s18  }
   0x6   : > { %s836_s24 = sadd.s32 1, %s771_s21   ;;  %s28_s25 = sadd.s32 1, %s767_s20 }
   0x7   : > { %s25_s26 = ssub.s32 %s771_s21, %s836_s24  ;;  %p35_p0 = scmp.ne.s32.totalorder %s767_s20, %s763_s19 }
   0x8   : > { %p26_p1 = scmp.eq.s32.totalorder %s25_s26, 0  ;;  %p36_p2 = scmp.eq.s32.totalorder %s771_s21, 0 }
   0x9   : > { %p41_p3 = scmp.ne.s32.totalorder %s763_s19, %s759_s18  ;;  %p42_p4 = scmp.eq.s32.totalorder %s832_s22, 0 }
   0xa   : > { %s848_s27 = scalar_select %p26_p1, %s767_s20, %s28_s25  }
   0xb   : > { %p850_p5 = por %p36_p2, %p35_p0  ;;  %p854_p6 = por %p42_p4, %p41_p3 }
   0xc   : > { %p149_p7 = scmp.eq.s32.totalorder %s832_s22, 1  ;;  %p155_p8 = scmp.eq.s32.totalorder %s581_s23, 1 }
   0xd   : > { %s1031_s29 = scalar_select %p854_p6, 1, 0 }
   0xe   : > { %p635_p10 = scmp.lt.s32.totalorder %s771_s21, 2  ;;  %p861_p11 = por %p149_p7, %p35_p0 }
   0xf   : > { %p865_p12 = por %p155_p8, %p41_p3  ;;  %s187_s7 = sand.u32 1, %s767_s20  }
  0x10   : > { %s1032_s30 = scalar_select %p861_p11, 1, 0 }
  0x11   : > { %s1033_s6 = scalar_select %p865_p12, 1, 0 }
  0x12   : > { %s598_s8 = sshll.u32 %s771_s21, 10  ;;  %s584_s9 = sshll.u32 %s187_s7, 6 }
  0x13   : > { %s874_s12 = scalar_lea.hbm %s1022_s0, %s598_s8  ;;  %s191_s13 = scalar_lea.vmem [#allocation2], %s584_s9 }
  0x14   : > { %s198_s14 = sshll.u32 %s191_s13, 4  ;;  %p878_p13 = pnand %p635_p10, %p850_p5  ;;  %s882_s14 = int_to_ptr.vmem [resolvable:$true] %s198_s14 }
  0x15   : > { %s884_s16 = scalar_lea.sflag [#allocation3], %s187_s7  ;;  %s679_s17 = scalar_lea.hbm %s874_s12, 1024 }
  0x16   : > { %p680_p0 = scmp.ne.s32.totalorder %s874_s12, %s679_s17  ;;  %p681_p1 = pneg %p878_p13 }
  0x17   : > { %s684_s26 = scalar_lea.hbm %s1022_s0, 2048  ;;  %p685_p4 = scmp.lt.s32.totalorder %s874_s12, %s1022_s0 }
  0x18   : > { %p682_p2 = pnand %p681_p1, %p680_p0  ;;  %p686_p5 = scmp.lt.s32.totalorder %s684_s26, %s679_s17 }
  0x1a   : > { %p683_p3 = pneg %p682_p2  ;;  %p687_p7 = por %p686_p5, %p685_p4 }
  0x1c   : > { %p688_p8 = pnand %p687_p7, %p683_p3 }
  0x1e   : > { %691 = shalt.err (!%p688_p8)
}
  0x1f   : > { %s692_s7 = scalar_lea.vmem %s882_s14, 1024  ;;  %s773_s9 = smov [#allocation2]  }
  0x20   : > { %p693_p10 = scmp.ne.s32.totalorder %s882_s14, %s692_s7  ;;  %s697_s10 = sshll.u32 %s773_s9, 4  ;;  %s698_s10 = int_to_ptr.vmem [resolvable:$false] %s697_s10 }
  0x21   : > { %s699_s11 = scalar_lea.vmem %s698_s10, 2048  ;;  %p700_p2 = scmp.lt.s32.totalorder %s882_s14, %s698_s10 }
  0x22   : > { %p695_p9 = pnand %p693_p10, %p681_p1  ;;  %p701_p12 = scmp.lt.s32.totalorder %s699_s11, %s692_s7 }
  0x24   : > { %p696_p0 = pneg %p695_p9  ;;  %p702_p11 = por %p701_p12, %p700_p2 }
  0x26   : > { %p703_p6 = pnand %p702_p11, %p696_p0 }
  0x28   : > { %706 = shalt.err (!%p703_p6)
}
  0x29   : > { %s774_s13 = smov 256   ;;  %s775_s17 = smov 16  }
  0x2a   : > { %630 = dma.hbm_to_vmem [thread:$0]  (!%p878_p13), %s874_s12, 1024, %s882_s14, %s884_s16, %s774_s13, %s774_s13, %s775_s17  }
  0x2b   : > { %p587_p9 = scmp.ge.s32.totalorder %s771_s21, 1  ;;  %p206_p1 = scmp.lt.s32.totalorder %s771_s21, 3 }
  0x2d   : > { %p207_p3 = pnand %p587_p9, %p206_p1 }
  0x2e   : > { %s908_s23 = sand.u32 (!%p207_p3), 1, %s763_s19   ;;  %p1035_p6 = scmp.ne.s32.totalorder (!%p207_p3), %s1031_s29, 0 }
  0x2f   : > { %210 = sbr.rel (%p207_p3) target bundleno = 770 (0x302), region = 40  ;;  %s588_s25 = sshll.u32 (!%p207_p3), %s908_s23, 6 }
  0x30   : > { %s213_s26 = scalar_lea.sflag (!%p207_p3), [#allocation3], %s908_s23  ;;  %s216_s28 = scalar_lea.vmem (!%p207_p3), [#allocation2], %s588_s25 }
  0x34   : > { %750 = dma.done.wait (%p1035_p6), %s213_s26, 1024  }
  0x35   : > { %752 = vsyncadd (%p1035_p6), %s213_s26, 4294966272  ;;  %v918_v0 = vld [vmem:[%s216_s28] sm:$0xff]  ;;  %v920_v1 = vld [vmem:[%s216_s28 + $0x8] sm:$0xff]  ;;  %v776_v12 = vmov 0.0   ;;  %vm777_vm0 = vmmov 0   ;;  %v276_v17 = vlaneseq  ;;  %vm287_vm1 = vcmask 130112  }
  0x36   : > { %v922_v2 = vld [vmem:[%s216_s28 + $0x20] sm:$0xff]  ;;  %v251_v3 = vadd.f32 %v920_v1, %v918_v0  ;;  %v926_v4 = vld [vmem:[%s216_s28 + $0x28] sm:$0xff]  ;;  %v928_v5 = vld [vmem:[%s216_s28 + $0x10] sm:$0xff]  ;;  %607 = vmatprep.subr.mxu0 %v776_v12  ;;  %618 = vmatprep.subr.mxu1 %v776_v12  ;;  %vm294_vm2 = vcmask 195712   ;;  %vm301_vm3 = vcmask 261312   ;;  %vm303_vm4 = vcmask 261120  }
  0x37   : > { %v930_v6 = vld [vmem:[%s216_s28 + $0x18] sm:$0xff]  ;;  %v257_v7 = vadd.f32 %v926_v4, %v922_v2  ;;  %v934_v8 = vld [vmem:[%s216_s28 + $0x30] sm:$0xff]  ;;  %v268_v15 = vld [vmem:[%s1023_s1 + $0x8] sm:$0xff]  ;;  %615 = vmatprep.mubr.msk.f32.mxu0 %vm777_vm0, %v776_v12  ;;  %620 = vmatprep.mubr.msk.f32.mxu1 %vm777_vm0, %v776_v12  ;;  %v277_v18 = vand.u32 127, %v276_v17  ;;  %v279_v19 = vshrl.u32 %v276_v17, 7  ;;  %vm379_vm5 = vcmask 64512  }
  0x38   : > { %v936_v9 = vld [vmem:[%s216_s28 + $0x38] sm:$0xff]  ;;  %252 = vadd.xlane.f32.xlu0 %v251_v3  ;;  %v254_v10 = vadd.f32 %v930_v6, %v928_v5  ;;  %v269_v14 = vld [vmem:[%s1023_s1 + $0x10] sm:$0xff]  ;;  %v267_v16 = vld [vmem:[%s1023_s1] sm:$0xff]  ;;  %s242_s29 = scalar_lea.vmem [#allocation5], %s588_s25  ;;  %s599_s14 = sshll.u32 %s832_s22, 10 }
  0x39   : > { %258 = vadd.xlane.f32.xlu1 %v257_v7  ;;  %v260_v11 = vadd.f32 %v936_v9, %v934_v8  ;;  %v270_v13 = vld [vmem:[%s1023_s1 + $0x18] sm:$0xff]  ;;  %v282_v20 = vadd.s32 4294967288, %v277_v18  ;;  %v289_v22 = vadd.s32 4294967280, %v277_v18  ;;  %v296_v23 = vadd.s32 4294967272, %v277_v18  ;;  %v377_v42 = vld [vmem:[%s1025_s3] sm:$0xff]  ;;  %s508_s12 = sshll.u32 %s242_s29, 4  ;;  %s977_s16 = scalar_lea.hbm %s1027_s5, %s599_s14  ;;  %s972_s12 = int_to_ptr.vmem [resolvable:$true] %s508_s12 }
  0x3a   : > { %608 = vmatpush3.msra.mxu0 %v270_v13  ;;  %v280_v25 = vsub.s32 %v277_v18, %v279_v19  ;;  %619 = vmatpush3.msra.mxu1 %v377_v42  ;;  %v271_v43 = vld [vmem:[%s1024_s2] sm:$0x1]  ;;  %v461_v55 = vsub.s32 0, %v279_v19  ;;  %s495_s22 = scalar_lea.sflag [#allocation4], %s908_s23  ;;  %s707_s8 = scalar_lea.vmem %s972_s12, 1024 }
  0x3b   : > { %609 = vmatprep.subr.mxu0 %v776_v12  ;;  %v285_v27 = vsub.s32 %v282_v20, %v279_v19  ;;  %v292_v28 = vsub.s32 %v289_v22, %v279_v19  ;;  %v299_v31 = vsub.s32 %v296_v23, %v279_v19  ;;  %v378_v48 = vld [vmem:[%s1026_s4] sm:$0x1]  ;;  %p708_p11 = scmp.ne.s32.totalorder %s972_s12, %s707_s8  ;;  %p1036_p12 = scmp.ne.s32.totalorder %s1032_s30, 0 }
  0x3c   : > { %255 = vadd.xlane.f32.xlu0 %v254_v10  ;;  %610 = vmatpush3.msra.mxu0 %v269_v14  ;;  %s778_s7 = smov [#allocation5]  }
  0x3d   : > { %261 = vadd.xlane.f32.xlu1 %v260_v11  ;;  %611 = vmatprep.subr.mxu0 %v776_v12  ;;  %p709_p13 = pnand %p708_p11, %p1036_p12  ;;  %s711_s9 = sshll.u32 %s778_s7, 4  ;;  %s712_s9 = int_to_ptr.vmem [resolvable:$false] %s711_s9 }
  0x3e   : > { %612 = vmatpush3.msra.mxu0 %v268_v15  ;;  %s713_s10 = scalar_lea.vmem %s712_s9, 2048  ;;  %p714_p5 = scmp.lt.s32.totalorder %s972_s12, %s712_s9 }
  0x3f   : > { %613 = vmatprep.subr.mxu0 %v776_v12  ;;  %p710_p4 = pneg %p709_p13  ;;  %p715_p7 = scmp.lt.s32.totalorder %s713_s10, %s707_s8 }
  0x40   : > { %614 = vmatpush3.msra.mxu0 %v267_v16 }
  0x41   : > { %p716_p8 = por %p715_p7, %p714_p5 }
  0x43   : > { %p717_p10 = pnand %p716_p8, %p710_p4 }
  0xc1   : > { %v253_v21 = vpop.xlane.xlu0 %252 }
  0xc2   : > { %v259_v24 = vpop.xlane.xlu1 %258  ;;  %v263_v26 = vmul.f32 0.00390625, %v253_v21 }
  0xc3   : > { %v265_v29 = vmul.f32 0.00390625, %v259_v24 }
  0xc4   : > { %v281_v35 = vrot.slane %v263_v26, %v280_v25 }
  0xc5   : > { %v256_v30 = vpop.xlane.xlu0 %255  ;;  %v293_v37 = vrot.slane %v265_v29, %v292_v28 }
  0xc6   : > { %v264_v32 = vmul.f32 0.00390625, %v256_v30  ;;  %v262_v33 = vpop.xlane.xlu1 %261 }
  0xc7   : > { %v266_v34 = vmul.f32 0.00390625, %v262_v33 }
  0xc8   : > { %v286_v36 = vrot.slane %v264_v32, %v285_v27 }
  0xc9   : > { %v300_v38 = vrot.slane %v266_v34, %v299_v31 }
  0xca   : > { %v288_v39 = vsel %vm287_vm1, %v286_v36, %v281_v35 }
  0xcb   : > { %v295_v40 = vsel %vm294_vm2, %v293_v37, %v288_v39 }
  0xcc   : > { %v302_v41 = vsel %vm301_vm3, %v300_v38, %v295_v40 }
  0xcd   : > { %616 = vmatmul.mubr.msk.f32.vlgmr.msra.gmra.mxu0 %vm303_vm4, %v302_v41 }
 0x18d   : > { %v372_v44 = vpop.f32.mrf.mxu0 }
 0x18e   : > { %v373_v45 = vadd.f32 %v372_v44, %v271_v43 }
 0x18f   : > { %v617_v46 = vpop.f32.mrf.mxu0 }
 0x190   : > { %v376_v47 = vmax.f32 %v373_v45, 0.0 }
 0x192   : > { %621 = vmatmul.mubr.msk.f32.vlgmr.msra.gmra.mxu1 %vm379_vm5, %v376_v47 }
 0x252   : > { %v449_v49 = vpop.f32.mrf.mxu1 }
 0x253   : > { %v450_v50 = vadd.f32 %v449_v49, %v378_v48 }
 0x254   : > { %v622_v51 = vpop.f32.mrf.mxu1 }
 0x255   : > { %v592_v52 = vmul.f32 -1.442695, %v450_v50 }
 0x257   : > { %675 = vpow2.f32 %v592_v52 }
 0x264   : > { %v676_v53 = vpop.eup %675 }
 0x265   : > { %v456_v54 = vadd.f32 1.0, %v676_v53 }
 0x267   : > { %677 = vrcp.f32 %v456_v54 }
 0x274   : > { %v678_v56 = vpop.eup %677 }
 0x275   : > { %v462_v57 = vrot.slane %v678_v56, %v461_v55 }
 0x277   : > { %468 = vbcast.lane.b32.xlu1 %v462_v57, 264  ;;  %464 = vbcast.lane.b32.xlu0 %v462_v57, 256 }
 0x27b   : > { %472 = vbcast.lane.b32.xlu1 %v462_v57, 272 }
 0x27f   : > { %476 = vbcast.lane.b32.xlu1 %v462_v57, 280 }
 0x2e9   : > { %v469_v58 = vpop.permute.xlu1 %468  ;;  %v465_v59 = vpop.permute.xlu0 %464 }
 0x2ea   : > { %v480_v60 = vmul.f32 %v469_v58, %v928_v5  ;;  %v481_v61 = vmul.f32 %v469_v58, %v930_v6  ;;  %v478_v62 = vmul.f32 %v465_v59, %v918_v0  ;;  %v479_v63 = vmul.f32 %v465_v59, %v920_v1 }
 0x2ec   : > { %488 = vst [vmem:[%s242_s29 + $0x10] sm:$0xff] %v480_v60  ;;  %489 = vst [vmem:[%s242_s29 + $0x18] sm:$0xff] %v481_v61 }
 0x2ed   : > { %486 = vst [vmem:[%s242_s29] sm:$0xff] %v478_v62  ;;  %487 = vst [vmem:[%s242_s29 + $0x8] sm:$0xff] %v479_v63  ;;  %v473_v3 = vpop.permute.xlu1 %472 }
 0x2ee   : > { %v482_v7 = vmul.f32 %v473_v3, %v922_v2  ;;  %v483_v5 = vmul.f32 %v473_v3, %v926_v4 }
 0x2f0   : > { %490 = vst [vmem:[%s242_s29 + $0x20] sm:$0xff] %v482_v7  ;;  %491 = vst [vmem:[%s242_s29 + $0x28] sm:$0xff] %v483_v5 }
 0x2f1   : > { %v477_v0 = vpop.permute.xlu1 %476 }
 0x2f2   : > { %v484_v1 = vmul.f32 %v477_v0, %v934_v8  ;;  %v485_v2 = vmul.f32 %v477_v0, %v936_v9 }
 0x2f4   : > { %492 = vst [vmem:[%s242_s29 + $0x30] sm:$0xff] %v484_v1  ;;  %493 = vst [vmem:[%s242_s29 + $0x38] sm:$0xff] %v485_v2 }
 0x2f5   : > { %720 = shalt.err (!%p717_p10)
}
 0x2f6   : > { %s721_s11 = scalar_lea.hbm %s977_s16, 1024  ;;  %s725_s26 = scalar_lea.hbm %s1027_s5, 2048 }
 0x2f7   : > { %p722_p0 = scmp.ne.s32.totalorder %s977_s16, %s721_s11  ;;  %p726_p1 = scmp.lt.s32.totalorder %s977_s16, %s1027_s5 }
 0x2f8   : > { %p727_p3 = scmp.lt.s32.totalorder %s725_s26, %s721_s11 }
 0x2f9   : > { %p723_p2 = pnand %p722_p0, %p1036_p12 }
 0x2fa   : > { %p728_p6 = por %p727_p3, %p726_p1 }
 0x2fb   : > { %p724_p9 = pneg %p723_p2 }
 0x2fd   : > { %p729_p11 = pnand %p728_p6, %p724_p9 }
 0x2ff   : > { %732 = shalt.err (!%p729_p11)
}
 0x300   : > { %s779_s14 = smov 256   ;;  %s780_s25 = smov 16  }
 0x301   : > { %625 = dma.vmem_to_hbm [thread:$0]  (%p1036_p12), %s972_s12, 1024, %s977_s16, %s495_s22, %s779_s14, %s779_s14, %s780_s25  }
 0x302 PF: > { %s523_s15 = sand.u32 1, %s759_s18   ;;  %p1037_p13 = scmp.ne.s32.totalorder %s1033_s6, 0 }
 0x303   : > { %p1038_p4 = scmp.ge.s32.totalorder %s771_s21, 2  ;;  %s524_s8 = scalar_lea.sflag [#allocation4], %s523_s15 }
 0x305   : > { %p632_p5 = pnand %p1038_p4, %p1037_p13 }
 0x307   : > { %p633_p7 = pneg %p632_p5 }
 0x309   : > { %754 = dma.done.wait (%p633_p7), %s524_s8, 1024  }
 0x30a   : > { %756 = vsyncadd (%p633_p7), %s524_s8, 4294966272  ;;  %p18_p8 = scmp.ge.s32.totalorder %s836_s24, 4   ;;  %s1039_s18 = smov %s763_s19 }
 0x30b   : > { %s1040_s19 = smov %s767_s20  ;;  %s1041_s20 = smov %s848_s27 }
 0x30c   : > { %s1042_s21 = smov %s836_s24  ;;  %20 = sbr.rel (!%p18_p8) target bundleno = 5 (0x5), region = 85 }
 0x311   :  { %529 = vsyncpa [#allocation3], 1 }
 0x312   :  { %531 = vsyncpa [#allocation3 + $0x1], 1 }
 0x313   :  { %532 = vsyncpa [#allocation4], 1 }
 0x314   :  { %534 = vsyncpa [#allocation4 + $0x1], 1 }

</bundles_post_ra>
